<compile_context>
chip_gen: v7x
topology: tpu7x:2x2x1
jax: 0.10.0
libtpu: 0.0.40
codegen_flags: <defaults>
</compile_context>

<pallas_src>
import functools
import math

import jax
import jax.numpy as jnp
import numpy as np
from jax.experimental import pallas as pl
from jax.experimental.pallas import tpu as pltpu

_VMEM_LIMIT_BYTES = 48 * 1024 * 1024        # below v7x physical (64 MiB), above scoped defaults
_RESIDENT_KV_BUDGET = 16 * 1024 * 1024      # budget for keeping k + h-values resident


def _round_up(x, m):
    return (x + m - 1) // m * m


def _device_defaults():
    """Per-generation tile defaults (v5e has less scoped VMEM / slower HBM)."""
    try:
        kind = jax.devices()[0].device_kind.lower()
    except Exception:  # pragma: no cover
        kind = ""
    if "v5e" in kind or "v5 lite" in kind or "v5lite" in kind:
        return 256, 512
    # v6e / v7x / default: bias toward large tiles (per-step overhead dominates).
    return 512, 1024


# ---------------------------------------------------------------------------
# Shared in-kernel helper: Lorentz "time/space" re-projection after W x + b.
# ---------------------------------------------------------------------------
def _lorentz_project(y, exp_scale, *, negate_time=False):
    col = jax.lax.broadcasted_iota(jnp.int32, y.shape, 1)
    y0 = y[:, 0:1]
    time = jax.nn.sigmoid(y0) * exp_scale + 1.0 + 0.0001          # (TN, 1)
    space = jnp.where(col == 0, 0.0, y)                           # mask time col
    sq = jnp.maximum(jnp.sum(space * space, axis=-1, keepdims=True), 1e-8)
    scaled = y * jnp.sqrt((time * time - 1.0) / sq)
    t = -time if negate_time else time                            # fold Minkowski sign
    return jnp.where(col == 0, t, scaled)


# ---------------------------------------------------------------------------
# Kernel A: fused h-projection + k-projection.
#   h = LorentzLinear(x);  k = LorentzLinear_k(h) with time column negated.
# ---------------------------------------------------------------------------
def _fused_h_k_kernel(x_ref, wt_ref, b_ref, wkt_ref, bk_ref, sc_ref,
                      h_ref, k_ref):
    # sc_ref (SMEM, f32[2]) = [exp(scale_h), exp(scale_k)]
    x = x_ref[...]                                                # (TN, Din)
    y = jnp.dot(x, wt_ref[...], preferred_element_type=jnp.float32) + b_ref[...]
    h = _lorentz_project(y, sc_ref[0])                            # (TN, D)
    h_ref[...] = h
    yk = jnp.dot(h, wkt_ref[...], preferred_element_type=jnp.float32) + bk_ref[...]
    # Time component negated here so the aggregation kernel uses a plain dot.
    k_ref[...] = _lorentz_project(yk, sc_ref[1], negate_time=True)


# ---------------------------------------------------------------------------
# Kernel B: fused q-projection + attention aggregation (kv-tiled).
#   grid = (row tiles, kv tiles); kv axis is "arbitrary"; accumulate in o_ref.
# ---------------------------------------------------------------------------
def _fused_q_agg_kernel(hq_ref, wqt_ref, bq_ref, k_ref, hv_ref, adj_ref, sc_ref,
                        o_ref, q_scr, *, kv_resident, tkv, adj_is_binary):
    # sc_ref (SMEM, f32[3]) = [exp(scale_q), 1/att_scale, att_bias]
    j = pl.program_id(1)

    @pl.when(j == 0)
    def _init():
        yq = jnp.dot(hq_ref[...], wqt_ref[...],
                     preferred_element_type=jnp.float32) + bq_ref[...]
        q_scr[...] = _lorentz_project(yq, sc_ref[0])              # (TN, D)
        o_ref[...] = jnp.zeros_like(o_ref)

    if kv_resident:
        # k / h-values are VMEM-resident full arrays; slice the kv window here.
        off = pl.multiple_of(j * tkv, tkv)
        k_tile = k_ref[pl.ds(off, tkv), :]
        hv_tile = hv_ref[pl.ds(off, tkv), :]
    else:
        k_tile = k_ref[...]
        hv_tile = hv_ref[...]

    # <q, k>_L : k's time column is already negated -> plain contraction on
    # the last axes (no in-kernel transpose of k).
    logits = 2.0 + 2.0 * jax.lax.dot_general(
        q_scr[...], k_tile,
        dimension_numbers=(((1,), (1,)), ((), ())),
        preferred_element_type=jnp.float32)                       # (TN, TKV)
    att = jax.nn.sigmoid(logits * sc_ref[1] + sc_ref[2])
    if adj_is_binary:
        att = jnp.where(adj_ref[...] != 0, att, 0.0)              # int8 0/1 mask (exact)
    else:
        att = att * adj_ref[...].astype(jnp.float32)              # weighted adjacency
    o_ref[...] += jnp.dot(att, hv_tile, preferred_element_type=jnp.float32)

    @pl.when(j == pl.num_programs(1) - 1)
    def _finalize():
        s = o_ref[...]
        col = jax.lax.broadcasted_iota(jnp.int32, s.shape, 1)
        space = jnp.where(col == 0, 0.0, s)
        s0 = s[:, 0:1]
        inner = jnp.sum(space * space, axis=-1, keepdims=True) - s0 * s0   # <s,s>_L
        denom = jnp.sqrt(jnp.maximum(jnp.abs(inner), 1e-8))
        o_ref[...] = s / denom


# ---------------------------------------------------------------------------
# Tile selection: pad N so every block divides evenly and respects (8, 128)
# (and int8's coarser sublane tiling for the adjacency).
# ---------------------------------------------------------------------------
def _choose_tiles(n, row_tile, kv_tile):
    if n <= row_tile:
        n_pad = _round_up(n, 32)               # single tile: blocks == full dims
        return n_pad, n_pad, n_pad
    n_pad = _round_up(n, row_tile)
    # row_tile divides kv_tile and both are multiples of 128, so tkv never
    # falls below row_tile (no 128-sized fallback anymore).
    tkv = kv_tile if n_pad % kv_tile == 0 else row_tile
    return n_pad, row_tile, tkv


# ---------------------------------------------------------------------------
# Full layer wrapper.
# ---------------------------------------------------------------------------
def lorentz_graph_convolution(inp, params, *, row_tile=None, kv_tile=None,
                              adj_is_binary=True, kv_resident=None):
    x, adj = inp
    n, d_in = x.shape
    d_out = params["w"].shape[0]

    if row_tile is None or kv_tile is None:
        dr, dk = _device_defaults()
        row_tile = dr if row_tile is None else row_tile
        kv_tile = dk if kv_tile is None else kv_tile
    assert row_tile % 128 == 0 and kv_tile % row_tile == 0, \
        "row_tile must be a multiple of 128 and divide kv_tile"

    n_pad, tn, tkv = _choose_tiles(n, row_tile, kv_tile)
    pad = n_pad - n

    if kv_resident is None:
        # k + h-values, x2 for worst-case double buffering.
        kv_resident = (2 * 2 * n_pad * d_out * 4) <= _RESIDENT_KV_BUDGET

    x_p = jnp.pad(x.astype(jnp.float32), ((0, pad), (0, 0)))
    # Padded rows/cols of adj are zero -> padded nodes never contribute.
    adj_p = jnp.pad(adj, ((0, pad), (0, pad)))
    if adj_is_binary:
        adj_p = (adj_p != 0).astype(jnp.int8)                     # exact 0/1 mask
    else:
        adj_p = adj_p.astype(jnp.float32)

    wt = jnp.transpose(params["w"]).astype(jnp.float32)           # (Din, D)
    wkt = jnp.transpose(params["wk"]).astype(jnp.float32)         # (D, D)
    wqt = jnp.transpose(params["wq"]).astype(jnp.float32)         # (D, D)
    b = params["b"].reshape(1, d_out).astype(jnp.float32)
    bk = params["bk"].reshape(1, d_out).astype(jnp.float32)
    bq = params["bq"].reshape(1, d_out).astype(jnp.float32)

    lin_scalars = jnp.stack(
        [jnp.exp(params["scale"]), jnp.exp(params["scale_k"])]).astype(jnp.float32)
    agg_scalars = jnp.stack(
        [jnp.exp(params["scale_q"]),
         1.0 / params["att_scale"],
         params["att_bias"]]).astype(jnp.float32)

    smem_spec = pl.BlockSpec(memory_space=pltpu.MemorySpace.SMEM)

    # ---- Kernel A: h and (time-negated) k ---------------------------------
    h, k_mink = pl.pallas_call(
        _fused_h_k_kernel,
        out_shape=(jax.ShapeDtypeStruct((n_pad, d_out), jnp.float32),
                   jax.ShapeDtypeStruct((n_pad, d_out), jnp.float32)),
        grid=(n_pad // tn,),
        in_specs=[
            pl.BlockSpec((tn, d_in), lambda i: (i, 0)),
            pl.BlockSpec((d_in, d_out), lambda i: (0, 0)),
            pl.BlockSpec((1, d_out), lambda i: (0, 0)),
            pl.BlockSpec((d_out, d_out), lambda i: (0, 0)),
            pl.BlockSpec((1, d_out), lambda i: (0, 0)),
            smem_spec,
        ],
        out_specs=(pl.BlockSpec((tn, d_out), lambda i: (i, 0)),
                   pl.BlockSpec((tn, d_out), lambda i: (i, 0))),
        compiler_params=pltpu.CompilerParams(
            dimension_semantics=("parallel",),
            vmem_limit_bytes=_VMEM_LIMIT_BYTES),
    )(x_p, wt, b, wkt, bk, lin_scalars)

    # ---- Kernel B: q-projection + kv-tiled attention aggregation ----------
    if kv_resident:
        # Constant block index -> fetched once, stays VMEM-resident across the
        # whole grid; HBM traffic for k / h-values becomes O(N) instead of O(N^2).
        k_spec = pl.BlockSpec((n_pad, d_out), lambda i, j: (0, 0))
        hv_spec = pl.BlockSpec((n_pad, d_out), lambda i, j: (0, 0))
    else:
        k_spec = pl.BlockSpec((tkv, d_out), lambda i, j: (j, 0))
        hv_spec = pl.BlockSpec((tkv, d_out), lambda i, j: (j, 0))

    kernel_b = functools.partial(_fused_q_agg_kernel,
                                 kv_resident=kv_resident,
                                 tkv=tkv,
                                 adj_is_binary=adj_is_binary)

    out = pl.pallas_call(
        kernel_b,
        out_shape=jax.ShapeDtypeStruct((n_pad, d_out), jnp.float32),
        grid=(n_pad // tn, n_pad // tkv),
        in_specs=[
            pl.BlockSpec((tn, d_out), lambda i, j: (i, 0)),       # h rows (query src)
            pl.BlockSpec((d_out, d_out), lambda i, j: (0, 0)),    # Wq^T
            pl.BlockSpec((1, d_out), lambda i, j: (0, 0)),        # bq
            k_spec,                                               # k (time negated)
            hv_spec,                                              # h values
            pl.BlockSpec((tn, tkv), lambda i, j: (i, j)),         # adj tile (int8/f32)
            smem_spec,
        ],
        out_specs=pl.BlockSpec((tn, d_out), lambda i, j: (i, 0)),
        scratch_shapes=[pltpu.VMEM((tn, d_out), jnp.float32)],    # q
        compiler_params=pltpu.CompilerParams(
            dimension_semantics=("parallel", "arbitrary"),
            vmem_limit_bytes=_VMEM_LIMIT_BYTES),
    )(h, wqt, bq, k_mink, h, adj_p, agg_scalars)

    return out[:n], adj


# ---------------------------------------------------------------------------
# Deterministic parameter init (mirrors LorentzLinear.reset_parameters)
# ---------------------------------------------------------------------------
def init_lorentz_linear_params(key, in_f, out_f, scale=10.0):
    stdv = 1.0 / math.sqrt(out_f)
    w = jax.random.uniform(key, (out_f, in_f), minval=-stdv, maxval=stdv,
                           dtype=jnp.float32)
    w = w.at[:, 0].set(0.0)
    b = jnp.zeros((out_f,), jnp.float32)
    s = jnp.asarray(math.log(scale), jnp.float32)
    return w, b, s


# ---------------------------------------------------------------------------
# Pure-JAX reference (defines the forward semantics for the check)
# ---------------------------------------------------------------------------
def _lorentz_linear_ref(x, w, b, scale):
    y = x @ w.T + b
    time = jax.nn.sigmoid(y[:, 0:1]) * jnp.exp(scale) + 1.0 + 0.0001
    xn = y[:, 1:]
    sq = jnp.maximum(jnp.sum(xn * xn, axis=-1, keepdims=True), 1e-8)
    coef = (time * time - 1.0) / sq
    return jnp.concatenate([time, xn * jnp.sqrt(coef)], axis=-1)


def _ref_forward(x, adj, p):
    h = _lorentz_linear_ref(x, p["w"], p["b"], p["scale"])
    q = _lorentz_linear_ref(h, p["wq"], p["bq"], p["scale_q"])
    k = _lorentz_linear_ref(h, p["wk"], p["bk"], p["scale_k"])
    qm = jnp.concatenate([-q[:, 0:1], q[:, 1:]], axis=-1)
    att = 2.0 + 2.0 * (qm @ k.T)
    att = jax.nn.sigmoid(att / p["att_scale"] + p["att_bias"])
    att = adj * att
    s = att @ h
    inner = -s[:, 0:1] ** 2 + jnp.sum(s[:, 1:] ** 2, axis=-1, keepdims=True)
    denom = jnp.sqrt(jnp.maximum(jnp.abs(-inner), 1e-8))
    return s / denom


if __name__ == "__main__":
    def run_case(n, in_f, out_f, seed, **kw):
        key = jax.random.PRNGKey(seed)
        k0, k1, k2, k3, k4 = jax.random.split(key, 5)

        x = jax.random.normal(k0, (n, in_f), dtype=jnp.float32)
        adj_rand = jax.random.uniform(k1, (n, n), dtype=jnp.float32)
        adj = (adj_rand < 0.2).astype(jnp.float32)
        adj = jnp.minimum(adj + adj.T + jnp.eye(n, dtype=jnp.float32), 1.0)

        w, b, s = init_lorentz_linear_params(k2, in_f, out_f)
        wq, bq, s_q = init_lorentz_linear_params(k3, out_f, out_f)
        wk, bk, s_k = init_lorentz_linear_params(k4, out_f, out_f)
        params = {
            "w": w, "b": b, "scale": s,
            "wq": wq, "bq": bq, "scale_q": s_q,
            "wk": wk, "bk": bk, "scale_k": s_k,
            "att_bias": jnp.asarray(20.0, jnp.float32),
            "att_scale": jnp.asarray(math.sqrt(out_f), jnp.float32),
        }

        h_out, _ = lorentz_graph_convolution((x, adj), params, **kw)
        h_out = jax.block_until_ready(h_out)
        ref = _ref_forward(x, adj, params)
        np.testing.assert_allclose(np.asarray(h_out), np.asarray(ref),
                                   rtol=2e-4, atol=2e-5)

    # Small case (single tile, no kv loop), device-default tiles, int8 adj mask.
    run_case(64, 16, 32, 0)
    # Multi-tile path: forces padding + kv accumulation with resident k / h-values.
    run_case(300, 16, 32, 1, row_tile=128, kv_tile=256)
    # Streamed (non-resident) k / h-values + weighted-adjacency (f32) path.
    run_case(300, 16, 32, 2, row_tile=128, kv_tile=128,
             kv_resident=False, adj_is_binary=False)

    print("KERNEL_OK")
</pallas_src>

<mosaic_0001>
module attributes {stable_mosaic.version = 11 : i64} {
  func.func @_fused_h_k_kernel(%arg0: i32, %arg1: memref<64x16xf32, #tpu.memory_space<vmem>>, %arg2: memref<16x32xf32, #tpu.memory_space<vmem>>, %arg3: memref<1x32xf32, #tpu.memory_space<vmem>>, %arg4: memref<32x32xf32, #tpu.memory_space<vmem>>, %arg5: memref<1x32xf32, #tpu.memory_space<vmem>>, %arg6: memref<2xf32, #tpu.memory_space<smem>>, %arg7: memref<64x32xf32, #tpu.memory_space<vmem>>, %arg8: memref<64x32xf32, #tpu.memory_space<vmem>>) attributes {dimension_semantics = [#tpu.dimension_semantics<parallel>], iteration_bounds = array<i64: 1>, scalar_prefetch = 0 : i64, scratch_operands = 0 : i64, tpu.core_type = #tpu.core_type<tc>, window_params = [{transform_indices = @transform_0, window_bounds = array<i64: 64, 16>}, {pipeline_mode = #tpu.pipeline_mode<synchronous>, transform_indices = @transform_1, window_bounds = array<i64: 16, 32>}, {pipeline_mode = #tpu.pipeline_mode<synchronous>, transform_indices = @transform_2, window_bounds = array<i64: 1, 32>}, {pipeline_mode = #tpu.pipeline_mode<synchronous>, transform_indices = @transform_3, window_bounds = array<i64: 32, 32>}, {pipeline_mode = #tpu.pipeline_mode<synchronous>, transform_indices = @transform_4, window_bounds = array<i64: 1, 32>}, {transform_indices = @transform_5, window_bounds = array<i64: 2>}, {transform_indices = @transform_6, window_bounds = array<i64: 64, 32>}, {transform_indices = @transform_7, window_bounds = array<i64: 64, 32>}]} {
    %c0 = arith.constant 0 : index
    %c0_0 = arith.constant 0 : index
    %0 = vector.load %arg1[%c0, %c0_0] : memref<64x16xf32, #tpu.memory_space<vmem>>, vector<64x16xf32>
    %c0_1 = arith.constant 0 : index
    %c0_2 = arith.constant 0 : index
    %1 = vector.load %arg2[%c0_1, %c0_2] : memref<16x32xf32, #tpu.memory_space<vmem>>, vector<16x32xf32>
    %cst = arith.constant dense<0.000000e+00> : vector<64x32xf32>
    %2 = tpu.matmul %0, %1, %cst {dimension_numbers = #tpu.dot_dimension_numbers<[1], [0], [0], [1], [0, 0, 1, 1], [], []>} : vector<64x16xf32>, vector<16x32xf32>, vector<64x32xf32> -> vector<64x32xf32>
    %c0_3 = arith.constant 0 : index
    %c0_4 = arith.constant 0 : index
    %3 = vector.load %arg3[%c0_3, %c0_4] : memref<1x32xf32, #tpu.memory_space<vmem>>, vector<1x32xf32>
    %4 = vector.broadcast %3 : vector<1x32xf32> to vector<64x32xf32>
    %5 = arith.addf %2, %4 : vector<64x32xf32>
    %c0_5 = arith.constant 0 : index
    %6 = memref.load %arg6[%c0_5] : memref<2xf32, #tpu.memory_space<smem>>
    %7 = tpu.iota {dimensions = array<i32: 1>} : vector<64x32xi32>
    %8 = vector.extract_strided_slice %5 {offsets = [0, 0], sizes = [64, 1], strides = [1, 1]} : vector<64x32xf32> to vector<64x1xf32>
    %9 = arith.negf %8 : vector<64x1xf32>
    %10 = math.exp %9 : vector<64x1xf32>
    %cst_6 = arith.constant 1.000000e+00 : f32
    %11 = vector.broadcast %cst_6 : f32 to vector<64x1xf32>
    %12 = arith.addf %11, %10 : vector<64x1xf32>
    %13 = arith.divf %11, %12 : vector<64x1xf32>
    %14 = vector.broadcast %6 : f32 to vector<64x1xf32>
    %15 = arith.mulf %13, %14 : vector<64x1xf32>
    %cst_7 = arith.constant 1.000000e+00 : f32
    %16 = vector.broadcast %cst_7 : f32 to vector<64x1xf32>
    %17 = arith.addf %15, %16 : vector<64x1xf32>
    %cst_8 = arith.constant 9.99999974E-5 : f32
    %18 = vector.broadcast %cst_8 : f32 to vector<64x1xf32>
    %19 = arith.addf %17, %18 : vector<64x1xf32>
    %c0_i32 = arith.constant 0 : i32
    %20 = vector.broadcast %c0_i32 : i32 to vector<64x32xi32>
    %21 = arith.cmpi eq, %7, %20 : vector<64x32xi32>
    %cst_9 = arith.constant 0.000000e+00 : f32
    %22 = vector.broadcast %cst_9 : f32 to vector<64x32xf32>
    %23 = arith.select %21, %22, %5 : vector<64x32xi1>, vector<64x32xf32>
    %24 = arith.mulf %23, %23 : vector<64x32xf32>
    %cst_10 = arith.constant dense<0.000000e+00> : vector<64xf32>
    %25 = vector.multi_reduction <add>, %24, %cst_10 [1] : vector<64x32xf32> to vector<64xf32>
    %26 = vector.shape_cast %25 : vector<64xf32> to vector<64x1xf32>
    %cst_11 = arith.constant 9.99999993E-9 : f32
    %27 = vector.broadcast %cst_11 : f32 to vector<64x1xf32>
    %28 = arith.maximumf %26, %27 : vector<64x1xf32>
    %29 = arith.mulf %19, %19 : vector<64x1xf32>
    %cst_12 = arith.constant 1.000000e+00 : f32
    %30 = vector.broadcast %cst_12 : f32 to vector<64x1xf32>
    %31 = arith.subf %29, %30 : vector<64x1xf32>
    %32 = arith.divf %31, %28 : vector<64x1xf32>
    %33 = math.sqrt %32 : vector<64x1xf32>
    %34 = vector.broadcast %33 : vector<64x1xf32> to vector<64x32xf32>
    %35 = arith.mulf %5, %34 : vector<64x32xf32>
    %c0_i32_13 = arith.constant 0 : i32
    %36 = vector.broadcast %c0_i32_13 : i32 to vector<64x32xi32>
    %37 = arith.cmpi eq, %7, %36 : vector<64x32xi32>
    %38 = vector.shape_cast %19 : vector<64x1xf32> to vector<64x1xf32>
    %39 = vector.broadcast %38 : vector<64x1xf32> to vector<64x32xf32>
    %40 = arith.select %37, %39, %35 : vector<64x32xi1>, vector<64x32xf32>
    %c0_14 = arith.constant 0 : index
    %c0_15 = arith.constant 0 : index
    %41 = vector.load %arg7[%c0_14, %c0_15] : memref<64x32xf32, #tpu.memory_space<vmem>>, vector<64x32xf32>
    tpu.vector_store %arg7[%c0_14, %c0_15], %40 {strides = array<i32>} : memref<64x32xf32, #tpu.memory_space<vmem>>, vector<64x32xf32>,
    %c0_16 = arith.constant 0 : index
    %c0_17 = arith.constant 0 : index
    %42 = vector.load %arg4[%c0_16, %c0_17] : memref<32x32xf32, #tpu.memory_space<vmem>>, vector<32x32xf32>
    %cst_18 = arith.constant dense<0.000000e+00> : vector<64x32xf32>
    %43 = tpu.matmul %40, %42, %cst_18 {dimension_numbers = #tpu.dot_dimension_numbers<[1], [0], [0], [1], [0, 0, 1, 1], [], []>} : vector<64x32xf32>, vector<32x32xf32>, vector<64x32xf32> -> vector<64x32xf32>
    %c0_19 = arith.constant 0 : index
    %c0_20 = arith.constant 0 : index
    %44 = vector.load %arg5[%c0_19, %c0_20] : memref<1x32xf32, #tpu.memory_space<vmem>>, vector<1x32xf32>
    %45 = vector.broadcast %44 : vector<1x32xf32> to vector<64x32xf32>
    %46 = arith.addf %43, %45 : vector<64x32xf32>
    %c1 = arith.constant 1 : index
    %47 = memref.load %arg6[%c1] : memref<2xf32, #tpu.memory_space<smem>>
    %48 = tpu.iota {dimensions = array<i32: 1>} : vector<64x32xi32>
    %49 = vector.extract_strided_slice %46 {offsets = [0, 0], sizes = [64, 1], strides = [1, 1]} : vector<64x32xf32> to vector<64x1xf32>
    %50 = arith.negf %49 : vector<64x1xf32>
    %51 = math.exp %50 : vector<64x1xf32>
    %cst_21 = arith.constant 1.000000e+00 : f32
    %52 = vector.broadcast %cst_21 : f32 to vector<64x1xf32>
    %53 = arith.addf %52, %51 : vector<64x1xf32>
    %54 = arith.divf %52, %53 : vector<64x1xf32>
    %55 = vector.broadcast %47 : f32 to vector<64x1xf32>
    %56 = arith.mulf %54, %55 : vector<64x1xf32>
    %cst_22 = arith.constant 1.000000e+00 : f32
    %57 = vector.broadcast %cst_22 : f32 to vector<64x1xf32>
    %58 = arith.addf %56, %57 : vector<64x1xf32>
    %cst_23 = arith.constant 9.99999974E-5 : f32
    %59 = vector.broadcast %cst_23 : f32 to vector<64x1xf32>
    %60 = arith.addf %58, %59 : vector<64x1xf32>
    %c0_i32_24 = arith.constant 0 : i32
    %61 = vector.broadcast %c0_i32_24 : i32 to vector<64x32xi32>
    %62 = arith.cmpi eq, %48, %61 : vector<64x32xi32>
    %cst_25 = arith.constant 0.000000e+00 : f32
    %63 = vector.broadcast %cst_25 : f32 to vector<64x32xf32>
    %64 = arith.select %62, %63, %46 : vector<64x32xi1>, vector<64x32xf32>
    %65 = arith.mulf %64, %64 : vector<64x32xf32>
    %cst_26 = arith.constant dense<0.000000e+00> : vector<64xf32>
    %66 = vector.multi_reduction <add>, %65, %cst_26 [1] : vector<64x32xf32> to vector<64xf32>
    %67 = vector.shape_cast %66 : vector<64xf32> to vector<64x1xf32>
    %cst_27 = arith.constant 9.99999993E-9 : f32
    %68 = vector.broadcast %cst_27 : f32 to vector<64x1xf32>
    %69 = arith.maximumf %67, %68 : vector<64x1xf32>
    %70 = arith.mulf %60, %60 : vector<64x1xf32>
    %cst_28 = arith.constant 1.000000e+00 : f32
    %71 = vector.broadcast %cst_28 : f32 to vector<64x1xf32>
    %72 = arith.subf %70, %71 : vector<64x1xf32>
    %73 = arith.divf %72, %69 : vector<64x1xf32>
    %74 = math.sqrt %73 : vector<64x1xf32>
    %75 = vector.broadcast %74 : vector<64x1xf32> to vector<64x32xf32>
    %76 = arith.mulf %46, %75 : vector<64x32xf32>
    %cst_29 = arith.constant 0.000000e+00 : f32
    %77 = vector.broadcast %cst_29 : f32 to vector<64x1xf32>
    %78 = arith.subf %77, %60 : vector<64x1xf32>
    %c0_i32_30 = arith.constant 0 : i32
    %79 = vector.broadcast %c0_i32_30 : i32 to vector<64x32xi32>
    %80 = arith.cmpi eq, %48, %79 : vector<64x32xi32>
    %81 = vector.shape_cast %78 : vector<64x1xf32> to vector<64x1xf32>
    %82 = vector.broadcast %81 : vector<64x1xf32> to vector<64x32xf32>
    %83 = arith.select %80, %82, %76 : vector<64x32xi1>, vector<64x32xf32>
    %c0_31 = arith.constant 0 : index
    %c0_32 = arith.constant 0 : index
    %84 = vector.load %arg8[%c0_31, %c0_32] : memref<64x32xf32, #tpu.memory_space<vmem>>, vector<64x32xf32>
    tpu.vector_store %arg8[%c0_31, %c0_32], %83 {strides = array<i32>} : memref<64x32xf32, #tpu.memory_space<vmem>>, vector<64x32xf32>,
    return
  }
  func.func @transform_0(%arg0: i32) -> (i32, i32) {
    %c0_i32 = arith.constant 0 : i32
    %c0_i32_0 = arith.constant 0 : i32
    return %arg0, %c0_i32 : i32, i32
  }
  func.func @transform_1(%arg0: i32) -> (i32, i32) {
    %c0_i32 = arith.constant 0 : i32
    %c0_i32_0 = arith.constant 0 : i32
    %c0_i32_1 = arith.constant 0 : i32
    return %c0_i32, %c0_i32_0 : i32, i32
  }
  func.func @transform_2(%arg0: i32) -> (i32, i32) {
    %c0_i32 = arith.constant 0 : i32
    %c0_i32_0 = arith.constant 0 : i32
    %c0_i32_1 = arith.constant 0 : i32
    return %c0_i32, %c0_i32_0 : i32, i32
  }
  func.func @transform_3(%arg0: i32) -> (i32, i32) {
    %c0_i32 = arith.constant 0 : i32
    %c0_i32_0 = arith.constant 0 : i32
    %c0_i32_1 = arith.constant 0 : i32
    return %c0_i32, %c0_i32_0 : i32, i32
  }
  func.func @transform_4(%arg0: i32) -> (i32, i32) {
    %c0_i32 = arith.constant 0 : i32
    %c0_i32_0 = arith.constant 0 : i32
    %c0_i32_1 = arith.constant 0 : i32
    return %c0_i32, %c0_i32_0 : i32, i32
  }
  func.func @transform_5(%arg0: i32) -> i32 {
    %c0_i32 = arith.constant 0 : i32
    %c0_i32_0 = arith.constant 0 : i32
    return %c0_i32 : i32
  }
  func.func @transform_6(%arg0: i32) -> (i32, i32) {
    %c0_i32 = arith.constant 0 : i32
    %c0_i32_0 = arith.constant 0 : i32
    return %arg0, %c0_i32 : i32, i32
  }
  func.func @transform_7(%arg0: i32) -> (i32, i32) {
    %c0_i32 = arith.constant 0 : i32
    %c0_i32_0 = arith.constant 0 : i32
    return %arg0, %c0_i32 : i32, i32
  }
}

</mosaic_0001>

<bundles_post_ra>
// kernel: tpu_custom_call.1
= control target key start
LH: loop header
LB: loop body
LE: loop exit
PB: predicated region body
PF: predicated region fallthrough
CT: control target
= control target key end

     0   :  { %13 = vsyncpa [#allocation3], 0  ;;  %s1646_s0 = inlined_call_operand.vmem [shape: f32[64,16], index: 0, kind: input, shape index: {}]   ;;  %s1647_s1 = inlined_call_operand.vmem [shape: f32[16,32], index: 1, kind: input, shape index: {}]   ;;  %s1648_s2 = inlined_call_operand.vmem [shape: f32[1,32], index: 2, kind: input, shape index: {}]   ;;  %s1649_s3 = inlined_call_operand.vmem [shape: f32[32,32], index: 3, kind: input, shape index: {}]   ;;  %s1650_s4 = inlined_call_operand.vmem [shape: f32[1,32], index: 4, kind: input, shape index: {}]   ;;  %s1651_s5 = inlined_call_operand.vmem [shape: f32[2], index: 5, kind: input, shape index: {}]   ;;  %s1652_s6 = inlined_call_operand.vmem [shape: f32[64,32], index: 6, kind: output, shape index: {0}]   ;;  %s1653_s7 = inlined_call_operand.vmem [shape: f32[64,32], index: 7, kind: output, shape index: {1}]  }
   0x1   :  { %s30_s26 = sshll.u32 %s1651_s5, 4  ;;  %s31_s26 = int_to_ptr.vmem [resolvable:$true] %s30_s26 }
   0x2   :  { %s1227_s27 = scalar_lea.vmem %s31_s26, 16  ;;  %p1232_p1 = scmp.lt.s32.totalorder %s31_s26, %s31_s26 }
   0x3   :  { %p1228_p0 = scmp.ne.s32.totalorder %s31_s26, %s1227_s27  ;;  %p1233_p2 = scmp.lt.s32.totalorder %s1227_s27, %s1227_s27 }
   0x5   :  { %p1234_p3 = por %p1233_p2, %p1232_p1 }
   0x7   :  { %p1235_p4 = pnand %p1234_p3, %p1228_p0 }
   0x9   :  { %1238 = shalt.err (!%p1235_p4)
}
   0xa   :  { %s1241_s28 = smov [#allocation2]  }
   0xb   :  { %33 = dma.vmem_to_smem %s31_s26, 16, %s1241_s28, [#allocation3]  }
   0xc   :  { %1239 = dma.done.wait [#allocation3], 16  }
   0xd   :  { %1240 = vsyncadd [#allocation3], 4294967280 }
   0xe   :  { %37 = sfence }
   0xf   :  { %v46_v0 = vld [vmem:[%s1647_s1] sm:$0xff]  ;;  %v47_v1 = vld [vmem:[%s1647_s1 + $0x8] sm:$0xff]  ;;  %vm55_vm0 = vcmask 130048   ;;  %v40_v5 = vld [vmem:[%s1646_s0 + $0x10] sm:$0xff]  ;;  %v1242_v11 = vmov 0   ;;  %v186_v12 = vlaneseq  ;;  %vm278_vm2 = vcmask 261120  }
  0x10   :  { %v38_v2 = vld [vmem:[%s1646_s0] sm:$0xff]  ;;  %v1083_v3 = vpack.c.bf16 %v47_v1, %v46_v0  ;;  %v39_v4 = vld [vmem:[%s1646_s0 + $0x8] sm:$0xff]  ;;  %v41_v6 = vld [vmem:[%s1646_s0 + $0x18] sm:$0xff]  ;;  %1097 = vset.pattern.permute.xlu1 %v1242_v11  ;;  %1098 = vset.pattern.permute.xlu0 %v1242_v11 }
  0x11   :  { %1051 = vmatprep.mubr.msk.f32.mxu0 %vm55_vm0, %v38_v2  ;;  %v42_v7 = vld [vmem:[%s1646_s0 + $0x20] sm:$0xff]  ;;  %v43_v8 = vld [vmem:[%s1646_s0 + $0x28] sm:$0xff]  ;;  %v44_v9 = vld [vmem:[%s1646_s0 + $0x30] sm:$0xff]  ;;  %v1324_v13 = vand.u32 127, %v186_v12 }
  0x12   :  { %1084 = vmatprep.subr.bf16.mxu0 %v1083_v3  ;;  %v45_v10 = vld [vmem:[%s1646_s0 + $0x38] sm:$0xff]  ;;  %v974_v14 = vld [vmem:[%s1648_s2] ss:$0 sm:$0xff]  ;;  %s185_s0 = sld [smem:[#allocation2]] }
  0x13   :  { %1086 = vmatpush3.bf16.msra.mxu0 %v1083_v3  ;;  %vm261_vm1 = vcmp.eq.s32.totalorder %v1324_v13, 0 }
  0x16   :  { %1052 = vmatmul.mubr.msk.f32.vlgmr.msra.gmra.mrb[0].mxu0 %vm55_vm0, %v39_v4 }
  0x17   :  { %1054 = vmatprep.mubr.msk.f32.mxu0 %vm55_vm0, %v40_v5 }
  0x1a   :  { %1055 = vmatmul.mubr.msk.f32.gmra.mrb[2].mxu0 %vm55_vm0, %v41_v6  ;;  %v1383_v6 = vstv %s185_s0 }
  0x1b   :  { %1057 = vmatprep.mubr.msk.f32.mxu0 %vm55_vm0, %v42_v7 }
  0x1e   :  { %1058 = vmatmul.mubr.msk.f32.gmra.mrb[4].mxu0 %vm55_vm0, %v43_v8 }
  0x1f   :  { %1060 = vmatprep.mubr.msk.f32.mxu0 %vm55_vm0, %v44_v9 }
  0x22   :  { %1061 = vmatmul.mubr.msk.f32.gmra.mrb[6].mxu0 %vm55_vm0, %v45_v10 }
  0xe9   :  { %v1053_v15 = vpop.f32.mrb[0].mxu0 }
  0xea   :  { %v1329_v16 = vadd.f32 %v1053_v15, %v974_v14  ;;  %v146_v17 = vpop.f32.mrb[1].mxu0 }
  0xeb   :  { %v1332_v18 = vadd.f32 %v974_v14, %v146_v17 }
  0xec   :  { %v984_v19 = vmul.f32 -1.442695, %v1329_v16  ;;  %v263_v23 = vsel %vm261_vm1, 0.0, %v1329_v16 }
  0xed   :  { %v983_v20 = vmul.f32 -1.442695, %v1332_v18  ;;  %v1056_v21 = vpop.f32.mrb[2].mxu0  ;;  %v262_v22 = vsel %vm261_vm1, 0.0, %v1332_v18  ;;  %v271_v30 = vmul.f32 %v263_v23, %v263_v23 }
  0xee   :  { %1099 = vpow2.f32 %v984_v19  ;;  %v1342_v24 = vadd.f32 %v1056_v21, %v974_v14  ;;  %v156_v25 = vpop.f32.mrb[3].mxu0  ;;  %v270_v26 = vmul.f32 %v262_v22, %v262_v22 }
  0xef   :  { %1101 = vpow2.f32 %v983_v20  ;;  %v1344_v27 = vadd.f32 %v974_v14, %v156_v25  ;;  %v282_v40 = vsel %vm278_vm2, %v271_v30, 0.0 }
  0xf0   :  { %v986_v28 = vmul.f32 -1.442695, %v1342_v24  ;;  %v279_v29 = vsel %vm278_vm2, %v270_v26, 0.0  ;;  %v265_v34 = vsel %vm261_vm1, 0.0, %v1342_v24 }
  0xf1   :  { %v985_v31 = vmul.f32 -1.442695, %v1344_v27  ;;  %v1059_v32 = vpop.f32.mrb[4].mxu0  ;;  %280 = vadd.xlane.f32.xlu0 %v279_v29  ;;  %v264_v33 = vsel %vm261_vm1, 0.0, %v1344_v27  ;;  %v273_v41 = vmul.f32 %v265_v34, %v265_v34 }
  0xf2   :  { %1103 = vpow2.f32 %v986_v28  ;;  %v1355_v35 = vadd.f32 %v1059_v32, %v974_v14  ;;  %v166_v36 = vpop.f32.mrb[5].mxu0  ;;  %v272_v37 = vmul.f32 %v264_v33, %v264_v33  ;;  %v503_v32 = vld [vmem:[%s1649_s3] sm:$0xff]  ;;  %v504_v33 = vld [vmem:[%s1649_s3 + $0x8] sm:$0xff] }
  0xf3   :  { %v1357_v38 = vadd.f32 %v974_v14, %v166_v36  ;;  %1105 = vpow2.f32 %v985_v31  ;;  %v288_v52 = vsel %vm278_vm2, %v273_v41, 0.0  ;;  %v1087_v34 = vpack.c.bf16 %v504_v33, %v503_v32 }
  0xf4   :  { %v285_v39 = vsel %vm278_vm2, %v272_v37, 0.0  ;;  %v267_v42 = vsel %vm261_vm1, 0.0, %v1355_v35  ;;  %v988_v36 = vmul.f32 -1.442695, %v1355_v35 }
  0xf5   :  { %v1062_v43 = vpop.f32.mrb[6].mxu0  ;;  %286 = vadd.xlane.f32.xlu1 %v285_v39  ;;  %283 = vadd.xlane.f32.xlu0 %v282_v40  ;;  %v266_v44 = vsel %vm261_vm1, 0.0, %v1357_v38  ;;  %v987_v45 = vmul.f32 -1.442695, %v1357_v38  ;;  %v275_v49 = vmul.f32 %v267_v42, %v267_v42 }
  0xf6   :  { %v1368_v46 = vadd.f32 %v1062_v43, %v974_v14  ;;  %v176_v47 = vpop.f32.mrb[7].mxu0  ;;  %v274_v48 = vmul.f32 %v266_v44, %v266_v44  ;;  %1088 = vmatprep.subr.bf16.mxu1 %v1087_v34 }
  0xf7   :  { %v1370_v50 = vadd.f32 %v974_v14, %v176_v47  ;;  %1107 = vpow2.f32 %v987_v45  ;;  %v294_v58 = vsel %vm278_vm2, %v275_v49, 0.0  ;;  %1090 = vmatpush3.bf16.msra.mxu1 %v1087_v34 }
  0xf8   :  { %v1100_v51 = vpop.eup %1099  ;;  %v291_v53 = vsel %vm278_vm2, %v274_v48, 0.0  ;;  %v269_v54 = vsel %vm261_vm1, 0.0, %v1368_v46  ;;  %v990_v39 = vmul.f32 -1.442695, %v1368_v46 }
  0xf9   :  { %v1102_v55 = vpop.eup %1101  ;;  %v213_v56 = vadd.f32 1.0, %v1100_v51  ;;  %289 = vadd.xlane.f32.xlu1 %v288_v52  ;;  %292 = vadd.xlane.f32.xlu0 %v291_v53  ;;  %v268_v57 = vsel %vm261_vm1, 0.0, %v1370_v50  ;;  %v277_v60 = vmul.f32 %v269_v54, %v269_v54  ;;  %v989_v37 = vmul.f32 -1.442695, %v1370_v50 }
  0xfa   :  { %v276_v59 = vmul.f32 %v268_v57, %v268_v57  ;;  %v212_v61 = vadd.f32 1.0, %v1102_v55 }
  0xfb   :  { %1109 = vrcp.f32 %v213_v56  ;;  %v300_v0 = vsel %vm278_vm2, %v277_v60, 0.0 }
  0xfc   :  { %v1104_v62 = vpop.eup %1103  ;;  %v297_v63 = vsel %vm278_vm2, %v276_v59, 0.0  ;;  %1111 = vrcp.f32 %v212_v61 }
  0xfd   :  { %295 = vadd.xlane.f32.xlu1 %v294_v58  ;;  %298 = vadd.xlane.f32.xlu0 %v297_v63  ;;  %v1106_v1 = vpop.eup %1105  ;;  %v215_v2 = vadd.f32 1.0, %v1104_v62 }
  0xfe   :  { %v214_v3 = vadd.f32 1.0, %v1106_v1 }
  0xff   :  { %1113 = vrcp.f32 %v215_v2 }
 0x100   :  { %1115 = vrcp.f32 %v214_v3 }
 0x101   :  { %301 = vadd.xlane.f32.xlu1 %v300_v0  ;;  %v1108_v4 = vpop.eup %1107 }
 0x102   :  { %v216_v7 = vadd.f32 1.0, %v1108_v4 }
 0x104   :  { %1117 = vrcp.f32 %v216_v7 }
 0x105   :  { %v1110_v5 = vpop.eup %1109  ;;  %1119 = vpow2.f32 %v988_v36 }
 0x106   :  { %v238_v8 = vmul.f32 %v1110_v5, %v1383_v6  ;;  %v1112_v9 = vpop.eup %1111  ;;  %1121 = vpow2.f32 %v989_v37 }
 0x107   :  { %v237_v11 = vmul.f32 %v1112_v9, %v1383_v6  ;;  %1123 = vpow2.f32 %v990_v39 }
 0x108   :  { %v246_v10 = vadd.f32 1.0, %v238_v8 }
 0x109   :  { %v1114_v12 = vpop.eup %1113  ;;  %v245_v15 = vadd.f32 1.0, %v237_v11 }
 0x10a   :  { %v254_v14 = vadd.f32 0.0001, %v246_v10  ;;  %v240_v17 = vmul.f32 %v1114_v12, %v1383_v6  ;;  %v1116_v19 = vpop.eup %1115 }
 0x10b   :  { %v253_v20 = vadd.f32 0.0001, %v245_v15  ;;  %v239_v22 = vmul.f32 %v1116_v19, %v1383_v6 }
 0x10c   :  { %v248_v21 = vadd.f32 1.0, %v240_v17  ;;  %v312_v0 = vmul.f32 %v254_v14, %v254_v14 }
 0x10d   :  { %v247_v26 = vadd.f32 1.0, %v239_v22  ;;  %v311_v56 = vmul.f32 %v253_v20, %v253_v20 }
 0x10e   :  { %v1118_v23 = vpop.eup %1117  ;;  %v256_v25 = vadd.f32 0.0001, %v248_v21  ;;  %v992_v15 = vadd.f32 -1.0, %v312_v0 }
 0x10f   :  { %v241_v28 = vmul.f32 %v1118_v23, %v1383_v6  ;;  %v255_v29 = vadd.f32 0.0001, %v247_v26  ;;  %v1120_v40 = vpop.eup %1119  ;;  %v991_v1 = vadd.f32 -1.0, %v311_v56 }
 0x110   :  { %v1122_v41 = vpop.eup %1121  ;;  %v217_v42 = vadd.f32 1.0, %v1120_v40  ;;  %v314_v17 = vmul.f32 %v256_v25, %v256_v25 }
 0x111   :  { %v249_v30 = vadd.f32 1.0, %v241_v28  ;;  %v1124_v43 = vpop.eup %1123  ;;  %v218_v44 = vadd.f32 1.0, %v1122_v41  ;;  %v313_v2 = vmul.f32 %v255_v29, %v255_v29 }
 0x112   :  { %454 = vperm.xlu1 %1097, %v254_v14   ;;  %1125 = vrcp.f32 %v217_v42  ;;  %v219_v45 = vadd.f32 1.0, %v1124_v43 }
 0x113   :  { %v1390_v31 = vadd.f32 0.0001, %v249_v30  ;;  %1127 = vrcp.f32 %v218_v44  ;;  %v993_v19 = vadd.f32 -1.0, %v313_v2 }
 0x114   :  { %1129 = vrcp.f32 %v219_v45 }
 0x115   :  { %v315_v23 = vmul.f32 %v1390_v31, %v1390_v31 }
 0x116   :  { %449 = vperm.xlu1 %1097, %v253_v20  }
 0x117   :  { %v995_v36 = vadd.f32 -1.0, %v315_v23 }
 0x11a   :  { %464 = vperm.xlu1 %1097, %v256_v25   ;;  %v994_v25 = vadd.f32 -1.0, %v314_v17 }
 0x11c   :  { %v1126_v52 = vpop.eup %1125 }
 0x11d   :  { %v1128_v55 = vpop.eup %1127  ;;  %v242_v59 = vmul.f32 %v1126_v52, %v1383_v6 }
 0x11e   :  { %459 = vperm.xlu1 %1097, %v255_v29   ;;  %v1130_v60 = vpop.eup %1129  ;;  %v243_v63 = vmul.f32 %v1128_v55, %v1383_v6 }
 0x11f   :  { %v244_v5 = vmul.f32 %v1130_v60, %v1383_v6  ;;  %v250_v7 = vadd.f32 1.0, %v242_v59  ;;  %v505_v60 = vld [vmem:[%s1649_s3 + $0x10] sm:$0xff] }
 0x120   :  { %v251_v10 = vadd.f32 1.0, %v243_v63 }
 0x121   :  { %v252_v14 = vadd.f32 1.0, %v244_v5  ;;  %v258_v21 = vadd.f32 0.0001, %v250_v7 }
 0x122   :  { %469 = vperm.xlu1 %1097, %v1390_v31   ;;  %v1407_v26 = vadd.f32 0.0001, %v251_v10 }
 0x123   :  { %v1411_v32 = vadd.f32 0.0001, %v252_v14  ;;  %v316_v33 = vmul.f32 %v258_v21, %v258_v21 }
 0x124   :  { %v317_v37 = vmul.f32 %v1407_v26, %v1407_v26 }
 0x125   :  { %v318_v41 = vmul.f32 %v1411_v32, %v1411_v32  ;;  %v996_v42 = vadd.f32 -1.0, %v316_v33 }
 0x126   :  { %v997_v44 = vadd.f32 -1.0, %v317_v37 }
 0x17e   :  { %v281_v47 = vpop.xlane.xlu0 %280 }
 0x17f   :  { %v303_v48 = vmax.f32 %v281_v47, 1e-08 }
 0x181   :  { %1131 = vrcp.f32 %v303_v48 }
 0x182   :  { %v287_v49 = vpop.xlane.xlu1 %286  ;;  %v284_v51 = vpop.xlane.xlu0 %283 }
 0x183   :  { %v305_v53 = vmax.f32 %v287_v49, 1e-08  ;;  %v304_v54 = vmax.f32 %v284_v51, 1e-08  ;;  %v998_v51 = vadd.f32 -1.0, %v318_v41 }
 0x185   :  { %1133 = vrcp.f32 %v305_v53 }
 0x186   :  { %1135 = vrcp.f32 %v304_v54  ;;  %v290_v57 = vpop.xlane.xlu1 %289  ;;  %v293_v58 = vpop.xlane.xlu0 %292 }
 0x187   :  { %v306_v61 = vmax.f32 %v290_v57, 1e-08  ;;  %v307_v62 = vmax.f32 %v293_v58, 1e-08 }
 0x189   :  { %1137 = vrcp.f32 %v306_v61  ;;  %v506_v61 = vld [vmem:[%s1649_s3 + $0x18] sm:$0xff] }
 0x18a   :  { %1139 = vrcp.f32 %v307_v62  ;;  %v296_v3 = vpop.xlane.xlu1 %295  ;;  %v299_v4 = vpop.xlane.xlu0 %298  ;;  %v1091_v0 = vpack.c.bf16 %v506_v61, %v505_v60 }
 0x18b   :  { %v1132_v8 = vpop.eup %1131  ;;  %v308_v9 = vmax.f32 %v296_v3, 1e-08  ;;  %v309_v11 = vmax.f32 %v299_v4, 1e-08 }
 0x18c   :  { %v328_v12 = vmul.f32 %v1132_v8, %v991_v1  ;;  %1092 = vmatprep.subr.bf16.mxu1 %v1091_v0 }
 0x18d   :  { %1141 = vrcp.f32 %v308_v9  ;;  %1094 = vmatpush3.bf16.msra.mxu1 %v1091_v0 }
 0x18e   :  { %1143 = vrcp.f32 %v309_v11  ;;  %v302_v20 = vpop.xlane.xlu1 %301  ;;  %vm345_vm3 = vcmp.eq.f32.partialorder %v328_v12, inf  ;;  %v348_v54 = vand.u32 2147483648, %v328_v12  ;;  %vm347_vm4 = vcmp.eq.f32.partialorder %v328_v12, 0.0 }
 0x18f   :  { %v1134_v22 = vpop.eup %1133  ;;  %v310_v6 = vmax.f32 %v302_v20, 1e-08  ;;  %1145 = vrsqrt.f32 %v328_v12 }
 0x190   :  { %v1136_v28 = vpop.eup %1135  ;;  %v1409_v29 = vmul.f32 %v1134_v22, %v993_v19 }
 0x191   :  { %v330_v30 = vmul.f32 %v1136_v28, %v992_v15  ;;  %1147 = vrcp.f32 %v310_v6 }
 0x192   :  { %vm359_vm9 = vcmp.eq.f32.partialorder %v1409_v29, inf  ;;  %v362_v20 = vand.u32 2147483648, %v1409_v29  ;;  %vm361_vm12 = vcmp.eq.f32.partialorder %v1409_v29, 0.0 }
 0x193   :  { %v1138_v34 = vpop.eup %1137  ;;  %1149 = vrsqrt.f32 %v330_v30  ;;  %vm352_vm5 = vcmp.eq.f32.partialorder %v330_v30, inf  ;;  %v355_v63 = vand.u32 2147483648, %v330_v30  ;;  %vm354_vm6 = vcmp.eq.f32.partialorder %v330_v30, 0.0 }
 0x194   :  { %v1140_v31 = vpop.eup %1139  ;;  %v334_v39 = vmul.f32 %v1138_v34, %v994_v25  ;;  %1151 = vrsqrt.f32 %v1409_v29 }
 0x195   :  { %v1415_v40 = vmul.f32 %v1140_v31, %v995_v36 }
 0x196   :  { %1153 = vrsqrt.f32 %v334_v39  ;;  %vm366_vm7 = vcmp.eq.f32.partialorder %v334_v39, inf  ;;  %v369_v5 = vand.u32 2147483648, %v334_v39  ;;  %vm368_vm8 = vcmp.eq.f32.partialorder %v334_v39, 0.0 }
 0x197   :  { %v1142_v43 = vpop.eup %1141  ;;  %1155 = vrsqrt.f32 %v1415_v40  ;;  %vm373_vm13 = vcmp.eq.f32.partialorder %v1415_v40, inf  ;;  %v376_v34 = vand.u32 2147483648, %v1415_v40  ;;  %vm375_vm0 = vcmp.eq.f32.partialorder %v1415_v40, 0.0 }
 0x198   :  { %v1144_v45 = vpop.eup %1143  ;;  %v338_v47 = vmul.f32 %v1142_v43, %v996_v42  ;;  %v455_v42 = vpop.permute.xlu1 %454 }
 0x199   :  { %v1146_v48 = vpop.eup %1145  ;;  %v1420_v49 = vmul.f32 %v1144_v45, %v997_v44 }
 0x19a   :  { %v344_v52 = vmul.f32 %v1146_v48, %v328_v12  ;;  %1157 = vrsqrt.f32 %v338_v47  ;;  %vm380_vm10 = vcmp.eq.f32.partialorder %v338_v47, inf  ;;  %v383_v17 = vand.u32 2147483648, %v338_v47 }
 0x19b   :  { %v1148_v53 = vpop.eup %1147  ;;  %1159 = vrsqrt.f32 %v1420_v49  ;;  %vm382_vm11 = vcmp.eq.f32.partialorder %v338_v47, 0.0 }
 0x19c   :  { %v342_v55 = vmul.f32 %v1148_v53, %v998_v51  ;;  %v346_v56 = vsel %vm345_vm3, %v328_v12, %v344_v52  ;;  %vm387_vm3 = vcmp.eq.f32.partialorder %v1420_v49, inf }
 0x19d   :  { %v1150_v57 = vpop.eup %1149  ;;  %v349_v58 = vsel %vm347_vm4, %v348_v54, %v346_v56  ;;  %vm389_vm4 = vcmp.eq.f32.partialorder %v1420_v49, 0.0 }
 0x19e   :  { %401 = vperm.xlu0 %1098, %v349_v58   ;;  %v351_v59 = vmul.f32 %v1150_v57, %v330_v30  ;;  %1161 = vrsqrt.f32 %v342_v55  ;;  %v1152_v62 = vpop.eup %1151  ;;  %vm394_vm14 = vcmp.eq.f32.partialorder %v342_v55, inf  ;;  %v397_v25 = vand.u32 2147483648, %v342_v55 }
 0x19f   :  { %v358_v7 = vmul.f32 %v1152_v62, %v1409_v29  ;;  %vm396_vm15 = vcmp.eq.f32.partialorder %v342_v55, 0.0 }
 0x1a0   :  { %v1154_v1 = vpop.eup %1153  ;;  %v353_v2 = vsel %vm352_vm5, %v330_v30, %v351_v59 }
 0x1a1   :  { %v356_v3 = vsel %vm354_vm6, %v355_v63, %v353_v2  ;;  %v365_v4 = vmul.f32 %v1154_v1, %v334_v39  ;;  %v1156_v8 = vpop.eup %1155  ;;  %v360_v15 = vsel %vm359_vm9, %v1409_v29, %v358_v7  ;;  %v999_v2 = vld [vmem:[%s1650_s4] ss:$0 sm:$0xff]  ;;  %s1008_s4 = sld [smem:[#allocation2 + $0x1]] }
 0x1a2   :  { %406 = vperm.xlu1 %1097, %v356_v3   ;;  %474 = vperm.xlu0 %1098, %v258_v21   ;;  %v372_v19 = vmul.f32 %v1156_v8, %v1415_v40  ;;  %v363_v6 = vsel %vm361_vm12, %v362_v20, %v360_v15 }
 0x1a3   :  { %v367_v9 = vsel %vm366_vm7, %v334_v39, %v365_v4  ;;  %v390_v39 = vand.u32 2147483648, %v1420_v49 }
 0x1a4   :  { %v1158_v10 = vpop.eup %1157  ;;  %v370_v11 = vsel %vm368_vm8, %v369_v5, %v367_v9  ;;  %v374_v30 = vsel %vm373_vm13, %v1415_v40, %v372_v19  ;;  %v450_v40 = vpop.permute.xlu1 %449 }
 0x1a5   :  { %v379_v12 = vmul.f32 %v1158_v10, %v338_v47  ;;  %v1160_v14 = vpop.eup %1159  ;;  %v377_v37 = vsel %vm375_vm0, %v376_v34, %v374_v30 }
 0x1a6   :  { %416 = vperm.xlu1 %1097, %v370_v11   ;;  %v386_v33 = vmul.f32 %v1160_v14, %v1420_v49 }
 0x1a7   :  { %v381_v21 = vsel %vm380_vm10, %v338_v47, %v379_v12 }
 0x1a8   :  { %v1162_v22 = vpop.eup %1161  ;;  %v384_v23 = vsel %vm382_vm11, %v383_v17, %v381_v21  ;;  %v388_v31 = vsel %vm387_vm3, %v1420_v49, %v386_v33  ;;  %v465_v43 = vpop.permute.xlu1 %464 }
 0x1a9   :  { %426 = vperm.xlu0 %1098, %v384_v23   ;;  %v393_v28 = vmul.f32 %v1162_v22, %v342_v55  ;;  %v391_v41 = vsel %vm389_vm4, %v390_v39, %v388_v31 }
 0x1aa   :  { %411 = vperm.xlu1 %1097, %v363_v6  }
 0x1ab   :  { %v395_v36 = vsel %vm394_vm14, %v342_v55, %v393_v28 }
 0x1ac   :  { %v398_v29 = vsel %vm396_vm15, %v397_v25, %v395_v36  ;;  %v460_v44 = vpop.permute.xlu1 %459 }
 0x1ad   :  { %436 = vperm.xlu0 %1098, %v398_v29  }
 0x1ae   :  { %421 = vperm.xlu1 %1097, %v377_v37  }
 0x1b0   :  { %v470_v45 = vpop.permute.xlu1 %469 }
 0x1b1   :  { %484 = vperm.xlu0 %1098, %v1411_v32  }
 0x1b2   :  { %431 = vperm.xlu1 %1097, %v391_v41  }
 0x1b6   :  { %479 = vperm.xlu1 %1097, %v1407_v26  }
 0x21d   :  { %v402_v47 = vpop.permute.xlu0 %401 }
 0x21e   :  { %v439_v48 = vmul.f32 %v402_v47, %v1332_v18 }
 0x220   :  { %v487_v51 = vsel %vm261_vm1, %v450_v40, %v439_v48 }
 0x221   :  { %v407_v52 = vpop.permute.xlu1 %406  ;;  %495 = vst.msk [vmem:[%s1652_s6] sm:$0xff] %vm278_vm2, %v487_v51  ;;  %1071 = vmatprep.mubr.msk.f32.mxu1 %vm278_vm2, %v487_v51  ;;  %v475_v32 = vpop.permute.xlu0 %474 }
 0x222   :  { %v440_v26 = vmul.f32 %v407_v52, %v1329_v16 }
 0x224   :  { %v488_v49 = vsel %vm261_vm1, %v455_v42, %v440_v26 }
 0x225   :  { %v417_v53 = vpop.permute.xlu1 %416  ;;  %496 = vst.msk [vmem:[%s1652_s6 + $0x8] sm:$0xff] %vm278_vm2, %v488_v49  ;;  %1072 = vmatmul.mubr.msk.f32.vlgmr.msra.gmra.mrb[0].mxu1 %vm278_vm2, %v488_v49 }
 0x226   :  { %v442_v18 = vmul.f32 %v417_v53, %v1342_v24 }
 0x228   :  { %v427_v54 = vpop.permute.xlu0 %426  ;;  %v490_v55 = vsel %vm261_vm1, %v465_v43, %v442_v18 }
 0x229   :  { %v412_v56 = vpop.permute.xlu1 %411  ;;  %v444_v16 = vmul.f32 %v427_v54, %v1355_v35  ;;  %498 = vst.msk [vmem:[%s1652_s6 + $0x18] sm:$0xff] %vm278_vm2, %v490_v55 }
 0x22a   :  { %v441_v57 = vmul.f32 %v412_v56, %v1344_v27 }
 0x22b   :  { %v492_v58 = vsel %vm261_vm1, %v475_v32, %v444_v16 }
 0x22c   :  { %v489_v24 = vsel %vm261_vm1, %v460_v44, %v441_v57  ;;  %v437_v59 = vpop.permute.xlu0 %436  ;;  %500 = vst.msk [vmem:[%s1652_s6 + $0x28] sm:$0xff] %vm278_vm2, %v492_v58 }
 0x22d   :  { %v422_v35 = vpop.permute.xlu1 %421  ;;  %497 = vst.msk [vmem:[%s1652_s6 + $0x10] sm:$0xff] %vm278_vm2, %v489_v24  ;;  %1074 = vmatprep.mubr.msk.f32.mxu1 %vm278_vm2, %v489_v24  ;;  %v446_v60 = vmul.f32 %v437_v59, %v1368_v46 }
 0x22e   :  { %v443_v27 = vmul.f32 %v422_v35, %v1357_v38  ;;  %1075 = vmatmul.mubr.msk.f32.gmra.mrb[2].mxu1 %vm278_vm2, %v490_v55 }
 0x230   :  { %v491_v61 = vsel %vm261_vm1, %v470_v45, %v443_v27  ;;  %v485_v62 = vpop.permute.xlu0 %484 }
 0x231   :  { %v432_v63 = vpop.permute.xlu1 %431  ;;  %499 = vst.msk [vmem:[%s1652_s6 + $0x20] sm:$0xff] %vm278_vm2, %v491_v61  ;;  %1077 = vmatprep.mubr.msk.f32.mxu1 %vm278_vm2, %v491_v61  ;;  %v494_v0 = vsel %vm261_vm1, %v485_v62, %v446_v60  ;;  %v1568_v60 = vstv %s1008_s4 }
 0x232   :  { %502 = vst.msk [vmem:[%s1652_s6 + $0x38] sm:$0xff] %vm278_vm2, %v494_v0  ;;  %1078 = vmatmul.mubr.msk.f32.gmra.mrb[4].mxu1 %vm278_vm2, %v492_v58  ;;  %v445_v38 = vmul.f32 %v432_v63, %v1370_v50 }
 0x235   :  { %v480_v46 = vpop.permute.xlu1 %479 }
 0x236   :  { %v493_v1 = vsel %vm261_vm1, %v480_v46, %v445_v38 }
 0x237   :  { %501 = vst.msk [vmem:[%s1652_s6 + $0x30] sm:$0xff] %vm278_vm2, %v493_v1  ;;  %1080 = vmatprep.mubr.msk.f32.mxu1 %vm278_vm2, %v493_v1 }
 0x238   :  { %1081 = vmatmul.mubr.msk.f32.gmra.mrb[6].mxu1 %vm278_vm2, %v494_v0 }
 0x2f8   :  { %v1073_v3 = vpop.f32.mrb[0].mxu1 }
 0x2f9   :  { %v1514_v4 = vadd.f32 %v1073_v3, %v999_v2  ;;  %v604_v50 = vpop.f32.mrb[1].mxu1 }
 0x2fa   :  { %v1516_v5 = vadd.f32 %v999_v2, %v604_v50 }
 0x2fb   :  { %v1010_v7 = vmul.f32 -1.442695, %v1514_v4  ;;  %v718_v8 = vsel %vm261_vm1, 0.0, %v1514_v4 }
 0x2fc   :  { %v1009_v9 = vmul.f32 -1.442695, %v1516_v5  ;;  %v726_v10 = vmul.f32 %v718_v8, %v718_v8  ;;  %v717_v11 = vsel %vm261_vm1, 0.0, %v1516_v5 }
 0x2fd   :  { %1163 = vpow2.f32 %v1010_v7  ;;  %v725_v12 = vmul.f32 %v717_v11, %v717_v11 }
 0x2fe   :  { %1165 = vpow2.f32 %v1009_v9  ;;  %v736_v15 = vsel %vm278_vm2, %v726_v10, 0.0 }
 0x2ff   :  { %737 = vadd.xlane.f32.xlu0 %v736_v15  ;;  %v733_v17 = vsel %vm278_vm2, %v725_v12, 0.0 }
 0x300   :  { %734 = vadd.xlane.f32.xlu1 %v733_v17 }
 0x301   :  { %v1076_v19 = vpop.f32.mrb[2].mxu1 }
 0x302   :  { %v1528_v14 = vadd.f32 %v1076_v19, %v999_v2  ;;  %v614_v20 = vpop.f32.mrb[3].mxu1 }
 0x303   :  { %v1530_v21 = vadd.f32 %v999_v2, %v614_v20 }
 0x304   :  { %v1012_v22 = vmul.f32 -1.442695, %v1528_v14  ;;  %v720_v23 = vsel %vm261_vm1, 0.0, %v1528_v14 }
 0x305   :  { %v1011_v6 = vmul.f32 -1.442695, %v1530_v21  ;;  %v1079_v28 = vpop.f32.mrb[4].mxu1  ;;  %v728_v30 = vmul.f32 %v720_v23, %v720_v23  ;;  %v719_v25 = vsel %vm261_vm1, 0.0, %v1530_v21 }
 0x306   :  { %1167 = vpow2.f32 %v1012_v22  ;;  %v1540_v33 = vadd.f32 %v1079_v28, %v999_v2  ;;  %v624_v34 = vpop.f32.mrb[5].mxu1  ;;  %v727_v36 = vmul.f32 %v719_v25, %v719_v25 }
 0x307   :  { %v1164_v29 = vpop.eup %1163  ;;  %1169 = vpow2.f32 %v1011_v6  ;;  %v1542_v37 = vadd.f32 %v999_v2, %v624_v34  ;;  %v742_v31 = vsel %vm278_vm2, %v728_v30, 0.0 }
 0x308   :  { %v1166_v39 = vpop.eup %1165  ;;  %v1014_v41 = vmul.f32 -1.442695, %v1540_v33  ;;  %743 = vadd.xlane.f32.xlu1 %v742_v31  ;;  %v739_v42 = vsel %vm278_vm2, %v727_v36, 0.0  ;;  %v722_v40 = vsel %vm261_vm1, 0.0, %v1540_v33  ;;  %v669_v48 = vadd.f32 1.0, %v1164_v29 }
 0x309   :  { %v668_v43 = vadd.f32 1.0, %v1166_v39  ;;  %v1013_v44 = vmul.f32 -1.442695, %v1542_v37  ;;  %740 = vadd.xlane.f32.xlu0 %v739_v42  ;;  %v730_v45 = vmul.f32 %v722_v40, %v722_v40  ;;  %v721_v47 = vsel %vm261_vm1, 0.0, %v1542_v37 }
 0x30a   :  { %v729_v51 = vmul.f32 %v721_v47, %v721_v47 }
 0x30b   :  { %1171 = vrcp.f32 %v668_v43  ;;  %v1082_v52 = vpop.f32.mrb[6].mxu1  ;;  %v748_v26 = vsel %vm278_vm2, %v730_v45, 0.0 }
 0x30c   :  { %1173 = vpow2.f32 %v1014_v41  ;;  %v1555_v32 = vadd.f32 %v1082_v52, %v999_v2  ;;  %749 = vadd.xlane.f32.xlu1 %v748_v26  ;;  %v634_v49 = vpop.f32.mrb[7].mxu1  ;;  %v745_v53 = vsel %vm278_vm2, %v729_v51, 0.0 }
 0x30d   :  { %1175 = vpow2.f32 %v1013_v44  ;;  %v1558_v18 = vadd.f32 %v999_v2, %v634_v49  ;;  %746 = vadd.xlane.f32.xlu0 %v745_v53 }
 0x30e   :  { %1177 = vrcp.f32 %v669_v48  ;;  %v724_v54 = vsel %vm261_vm1, 0.0, %v1555_v32  ;;  %v1016_v43 = vmul.f32 -1.442695, %v1555_v32 }
 0x30f   :  { %v732_v55 = vmul.f32 %v724_v54, %v724_v54  ;;  %v723_v56 = vsel %vm261_vm1, 0.0, %v1558_v18  ;;  %v1015_v44 = vmul.f32 -1.442695, %v1558_v18 }
 0x310   :  { %v1168_v16 = vpop.eup %1167  ;;  %v731_v57 = vmul.f32 %v723_v56, %v723_v56 }
 0x311   :  { %v1170_v58 = vpop.eup %1169  ;;  %v671_v24 = vadd.f32 1.0, %v1168_v16  ;;  %v754_v59 = vsel %vm278_vm2, %v732_v55, 0.0 }
 0x312   :  { %v670_v35 = vadd.f32 1.0, %v1170_v58  ;;  %755 = vadd.xlane.f32.xlu1 %v754_v59  ;;  %v751_v27 = vsel %vm278_vm2, %v731_v57, 0.0 }
 0x313   :  { %1179 = vrcp.f32 %v671_v24  ;;  %752 = vadd.xlane.f32.xlu0 %v751_v27 }
 0x314   :  { %1181 = vrcp.f32 %v670_v35 }
 0x315   :  { %v1172_v61 = vpop.eup %1171 }
 0x316   :  { %v1174_v62 = vpop.eup %1173  ;;  %v693_v63 = vmul.f32 %v1172_v61, %v1568_v60 }
 0x317   :  { %v1176_v0 = vpop.eup %1175  ;;  %v673_v38 = vadd.f32 1.0, %v1174_v62 }
 0x318   :  { %v1178_v46 = vpop.eup %1177  ;;  %v672_v1 = vadd.f32 1.0, %v1176_v0  ;;  %v701_v2 = vadd.f32 1.0, %v693_v63 }
 0x319   :  { %1183 = vrcp.f32 %v673_v38  ;;  %v694_v3 = vmul.f32 %v1178_v46, %v1568_v60 }
 0x31a   :  { %1185 = vrcp.f32 %v672_v1  ;;  %v709_v7 = vadd.f32 0.0001, %v701_v2 }
 0x31b   :  { %v702_v10 = vadd.f32 1.0, %v694_v3  ;;  %1187 = vpow2.f32 %v1016_v43 }
 0x31c   :  { %v901_v12 = vsub.f32 0.0, %v709_v7  ;;  %1189 = vpow2.f32 %v1015_v44  ;;  %v765_v55 = vmul.f32 %v709_v7, %v709_v7 }
 0x31d   :  { %v1180_v50 = vpop.eup %1179  ;;  %v710_v20 = vadd.f32 0.0001, %v702_v10 }
 0x31e   :  { %v1182_v8 = vpop.eup %1181  ;;  %v696_v11 = vmul.f32 %v1180_v50, %v1568_v60  ;;  %v1017_v61 = vadd.f32 -1.0, %v765_v55 }
 0x31f   :  { %v695_v9 = vmul.f32 %v1182_v8, %v1568_v60  ;;  %v902_v25 = vsub.f32 0.0, %v710_v20  ;;  %v766_v54 = vmul.f32 %v710_v20, %v710_v20 }
 0x320   :  { %v704_v22 = vadd.f32 1.0, %v696_v11 }
 0x321   :  { %v703_v15 = vadd.f32 1.0, %v695_v9  ;;  %v1018_v35 = vadd.f32 -1.0, %v766_v54 }
 0x322   :  { %v712_v36 = vadd.f32 0.0001, %v704_v22 }
 0x323   :  { %v1184_v17 = vpop.eup %1183  ;;  %911 = vperm.xlu1 %1097, %v901_v12   ;;  %v711_v19 = vadd.f32 0.0001, %v703_v15 }
 0x324   :  { %v1186_v23 = vpop.eup %1185  ;;  %v698_v6 = vmul.f32 %v1184_v17, %v1568_v60  ;;  %v904_v41 = vsub.f32 0.0, %v712_v36  ;;  %v768_v7 = vmul.f32 %v712_v36, %v712_v36 }
 0x325   :  { %v903_v28 = vsub.f32 0.0, %v711_v19  ;;  %v697_v30 = vmul.f32 %v1186_v23, %v1568_v60  ;;  %v1188_v45 = vpop.eup %1187  ;;  %v767_v9 = vmul.f32 %v711_v19, %v711_v19 }
 0x326   :  { %v706_v29 = vadd.f32 1.0, %v698_v6  ;;  %v1190_v47 = vpop.eup %1189  ;;  %v675_v48 = vadd.f32 1.0, %v1188_v45  ;;  %v1020_v17 = vadd.f32 -1.0, %v768_v7 }
 0x327   :  { %921 = vperm.xlu1 %1097, %v903_v28   ;;  %v705_v34 = vadd.f32 1.0, %v697_v30  ;;  %v674_v51 = vadd.f32 1.0, %v1190_v47  ;;  %v1019_v28 = vadd.f32 -1.0, %v767_v9 }
 0x328   :  { %v714_v42 = vadd.f32 0.0001, %v706_v29  ;;  %1191 = vrcp.f32 %v675_v48 }
 0x329   :  { %916 = vperm.xlu0 %1098, %v902_v25   ;;  %v713_v31 = vadd.f32 0.0001, %v705_v34  ;;  %1193 = vrcp.f32 %v674_v51 }
 0x32a   :  { %v906_v40 = vsub.f32 0.0, %v714_v42  ;;  %v770_v20 = vmul.f32 %v714_v42, %v714_v42 }
 0x32b   :  { %v905_v39 = vsub.f32 0.0, %v713_v31  ;;  %v769_v30 = vmul.f32 %v713_v31, %v713_v31 }
 0x32c   :  { %v1022_v36 = vadd.f32 -1.0, %v770_v20 }
 0x32d   :  { %931 = vperm.xlu1 %1097, %v905_v39   ;;  %926 = vperm.xlu0 %1098, %v904_v41   ;;  %v1021_v41 = vadd.f32 -1.0, %v769_v30 }
 0x331   :  { %936 = vperm.xlu0 %1098, %v906_v40  }
 0x332   :  { %v1192_v16 = vpop.eup %1191 }
 0x333   :  { %v1194_v59 = vpop.eup %1193  ;;  %v700_v63 = vmul.f32 %v1192_v16, %v1568_v60 }
 0x334   :  { %v699_v50 = vmul.f32 %v1194_v59, %v1568_v60 }
 0x335   :  { %v708_v8 = vadd.f32 1.0, %v700_v63 }
 0x336   :  { %v707_v12 = vadd.f32 1.0, %v699_v50 }
 0x337   :  { %v1580_v22 = vadd.f32 0.0001, %v708_v8 }
 0x338   :  { %v1582_v19 = vadd.f32 0.0001, %v707_v12 }
 0x339   :  { %v772_v29 = vmul.f32 %v1580_v22, %v1580_v22 }
 0x33a   :  { %v771_v31 = vmul.f32 %v1582_v19, %v1582_v19 }
 0x33b   :  { %v1024_v47 = vadd.f32 -1.0, %v772_v29  ;;  %v908_v29 = vsub.f32 0.0, %v1580_v22 }
 0x33c   :  { %v1023_v54 = vadd.f32 -1.0, %v771_v31 }
 0x38c   :  { %v738_v52 = vpop.xlane.xlu0 %737 }
 0x38d   :  { %v758_v26 = vmax.f32 %v738_v52, 1e-08  ;;  %v735_v49 = vpop.xlane.xlu1 %734 }
 0x38e   :  { %v757_v53 = vmax.f32 %v735_v49, 1e-08 }
 0x38f   :  { %1195 = vrcp.f32 %v758_v26 }
 0x390   :  { %1197 = vrcp.f32 %v757_v53 }
 0x395   :  { %v744_v56 = vpop.xlane.xlu1 %743 }
 0x396   :  { %v760_v57 = vmax.f32 %v744_v56, 1e-08  ;;  %v741_v58 = vpop.xlane.xlu0 %740 }
 0x397   :  { %v759_v24 = vmax.f32 %v741_v58, 1e-08 }
 0x398   :  { %1199 = vrcp.f32 %v760_v57 }
 0x399   :  { %v1196_v27 = vpop.eup %1195  ;;  %1201 = vrcp.f32 %v759_v24  ;;  %v750_v62 = vpop.xlane.xlu1 %749 }
 0x39a   :  { %v1198_v0 = vpop.eup %1197  ;;  %v784_v38 = vmul.f32 %v1196_v27, %v1018_v35  ;;  %v762_v46 = vmax.f32 %v750_v62, 1e-08  ;;  %v747_v1 = vpop.xlane.xlu0 %746 }
 0x39b   :  { %v782_v2 = vmul.f32 %v1198_v0, %v1017_v61  ;;  %v761_v3 = vmax.f32 %v747_v1, 1e-08 }
 0x39c   :  { %1203 = vrcp.f32 %v762_v46  ;;  %vm806_vm5 = vcmp.eq.f32.partialorder %v784_v38, inf  ;;  %v809_v51 = vand.u32 2147483648, %v784_v38  ;;  %vm808_vm6 = vcmp.eq.f32.partialorder %v784_v38, 0.0 }
 0x39d   :  { %1205 = vrcp.f32 %v761_v3  ;;  %vm799_vm7 = vcmp.eq.f32.partialorder %v782_v2, inf  ;;  %v802_v49 = vand.u32 2147483648, %v782_v2  ;;  %vm801_vm8 = vcmp.eq.f32.partialorder %v782_v2, 0.0 }
 0x39e   :  { %1207 = vrsqrt.f32 %v784_v38 }
 0x39f   :  { %v756_v10 = vpop.xlane.xlu1 %755  ;;  %1209 = vrsqrt.f32 %v782_v2 }
 0x3a0   :  { %v764_v11 = vmax.f32 %v756_v10, 1e-08  ;;  %v753_v15 = vpop.xlane.xlu0 %752 }
 0x3a1   :  { %v763_v23 = vmax.f32 %v753_v15, 1e-08 }
 0x3a2   :  { %v1200_v6 = vpop.eup %1199  ;;  %1211 = vrcp.f32 %v764_v11 }
 0x3a3   :  { %v1202_v60 = vpop.eup %1201  ;;  %v788_v25 = vmul.f32 %v1200_v6, %v1020_v17  ;;  %1213 = vrcp.f32 %v763_v23 }
 0x3a4   :  { %v786_v34 = vmul.f32 %v1202_v60, %v1019_v28 }
 0x3a5   :  { %1215 = vrsqrt.f32 %v788_v25  ;;  %vm820_vm9 = vcmp.eq.f32.partialorder %v788_v25, inf  ;;  %v823_v61 = vand.u32 2147483648, %v788_v25  ;;  %vm822_vm10 = vcmp.eq.f32.partialorder %v788_v25, 0.0 }
 0x3a6   :  { %v1204_v39 = vpop.eup %1203  ;;  %1217 = vrsqrt.f32 %v786_v34  ;;  %vm813_vm11 = vcmp.eq.f32.partialorder %v786_v34, inf  ;;  %v816_v0 = vand.u32 2147483648, %v786_v34  ;;  %vm815_vm12 = vcmp.eq.f32.partialorder %v786_v34, 0.0 }
 0x3a7   :  { %v1206_v42 = vpop.eup %1205  ;;  %v792_v40 = vmul.f32 %v1204_v39, %v1022_v36  ;;  %v907_v39 = vsub.f32 0.0, %v1582_v19 }
 0x3a8   :  { %v1208_v43 = vpop.eup %1207  ;;  %v790_v44 = vmul.f32 %v1206_v42, %v1021_v41  ;;  %v912_v41 = vpop.permute.xlu1 %911 }
 0x3a9   :  { %v1210_v45 = vpop.eup %1209  ;;  %v805_v48 = vmul.f32 %v1208_v43, %v784_v38  ;;  %1219 = vrsqrt.f32 %v792_v40  ;;  %vm834_vm13 = vcmp.eq.f32.partialorder %v792_v40, inf  ;;  %v837_v7 = vand.u32 2147483648, %v792_v40  ;;  %v917_v42 = vpop.permute.xlu0 %916 }
 0x3aa   :  { %v798_v52 = vmul.f32 %v1210_v45, %v782_v2  ;;  %1221 = vrsqrt.f32 %v790_v44  ;;  %vm836_vm14 = vcmp.eq.f32.partialorder %v792_v40, 0.0  ;;  %vm827_vm15 = vcmp.eq.f32.partialorder %v790_v44, inf }
 0x3ab   :  { %v807_v26 = vsel %vm806_vm5, %v784_v38, %v805_v48  ;;  %v830_v10 = vand.u32 2147483648, %v790_v44  ;;  %vm829_vm0 = vcmp.eq.f32.partialorder %v790_v44, 0.0 }
 0x3ac   :  { %v1212_v53 = vpop.eup %1211  ;;  %v810_v55 = vsel %vm808_vm6, %v809_v51, %v807_v26  ;;  %v800_v56 = vsel %vm799_vm7, %v782_v2, %v798_v52 }
 0x3ad   :  { %v1214_v16 = vpop.eup %1213  ;;  %v796_v57 = vmul.f32 %v1212_v53, %v1024_v47  ;;  %860 = vperm.xlu1 %1097, %v810_v55   ;;  %v803_v58 = vsel %vm801_vm8, %v802_v49, %v800_v56  ;;  %v927_v43 = vpop.permute.xlu0 %926 }
 0x3ae   :  { %v794_v24 = vmul.f32 %v1214_v16, %v1023_v54  ;;  %855 = vperm.xlu0 %1098, %v803_v58  }
 0x3af   :  { %v1216_v59 = vpop.eup %1215  ;;  %1223 = vrsqrt.f32 %v796_v57  ;;  %vm848_vm3 = vcmp.eq.f32.partialorder %v796_v57, inf  ;;  %v851_v6 = vand.u32 2147483648, %v796_v57  ;;  %vm850_vm4 = vcmp.eq.f32.partialorder %v796_v57, 0.0 }
 0x3b0   :  { %v1218_v35 = vpop.eup %1217  ;;  %v819_v27 = vmul.f32 %v1216_v59, %v788_v25  ;;  %1225 = vrsqrt.f32 %v794_v24  ;;  %vm841_vm5 = vcmp.eq.f32.partialorder %v794_v24, inf  ;;  %v844_v60 = vand.u32 2147483648, %v794_v24 }
 0x3b1   :  { %v812_v62 = vmul.f32 %v1218_v35, %v786_v34  ;;  %vm843_vm6 = vcmp.eq.f32.partialorder %v794_v24, 0.0  ;;  %v937_v31 = vpop.permute.xlu0 %936 }
 0x3b2   :  { %v821_v63 = vsel %vm820_vm9, %v788_v25, %v819_v27 }
 0x3b3   :  { %v1220_v38 = vpop.eup %1219  ;;  %v824_v46 = vsel %vm822_vm10, %v823_v61, %v821_v63  ;;  %v814_v1 = vsel %vm813_vm11, %v786_v34, %v812_v62 }
 0x3b4   :  { %v1222_v2 = vpop.eup %1221  ;;  %870 = vperm.xlu0 %1098, %v824_v46   ;;  %v817_v3 = vsel %vm815_vm12, %v816_v0, %v814_v1  ;;  %v833_v50 = vmul.f32 %v1220_v38, %v792_v40 }
 0x3b5   :  { %865 = vperm.xlu1 %1097, %v817_v3   ;;  %v826_v8 = vmul.f32 %v1222_v2, %v790_v44 }
 0x3b6   :  { %v835_v9 = vsel %vm834_vm13, %v792_v40, %v833_v50  ;;  %v922_v40 = vpop.permute.xlu1 %921 }
 0x3b7   :  { %v838_v11 = vsel %vm836_vm14, %v837_v7, %v835_v9  ;;  %v828_v12 = vsel %vm827_vm15, %v790_v44, %v826_v8 }
 0x3b8   :  { %880 = vperm.xlu0 %1098, %v838_v11   ;;  %v831_v15 = vsel %vm829_vm0, %v830_v10, %v828_v12 }
 0x3b9   :  { %v1224_v17 = vpop.eup %1223  ;;  %875 = vperm.xlu1 %1097, %v831_v15  }
 0x3ba   :  { %v1226_v20 = vpop.eup %1225  ;;  %v847_v23 = vmul.f32 %v1224_v17, %v796_v57  ;;  %v932_v44 = vpop.permute.xlu1 %931 }
 0x3bb   :  { %v840_v28 = vmul.f32 %v1226_v20, %v794_v24 }
 0x3bc   :  { %v849_v30 = vsel %vm848_vm3, %v796_v57, %v847_v23 }
 0x3bd   :  { %v852_v25 = vsel %vm850_vm4, %v851_v6, %v849_v30  ;;  %v842_v34 = vsel %vm841_vm5, %v794_v24, %v840_v28 }
 0x3be   :  { %890 = vperm.xlu0 %1098, %v852_v25   ;;  %v845_v36 = vsel %vm843_vm6, %v844_v60, %v842_v34 }
 0x3bf   :  { %885 = vperm.xlu1 %1097, %v845_v36  }
 0x3c2   :  { %946 = vperm.xlu0 %1098, %v908_v29  }
 0x3c3   :  { %941 = vperm.xlu1 %1097, %v907_v39  }
 0x42c   :  { %v861_v45 = vpop.permute.xlu1 %860 }
 0x42d   :  { %v894_v47 = vmul.f32 %v861_v45, %v1514_v4  ;;  %v856_v48 = vpop.permute.xlu0 %855 }
 0x42e   :  { %v893_v51 = vmul.f32 %v856_v48, %v1516_v5 }
 0x42f   :  { %v950_v52 = vsel %vm261_vm1, %v917_v42, %v894_v47 }
 0x430   :  { %958 = vst.msk [vmem:[%s1653_s7 + $0x8] sm:$0xff] %vm278_vm2, %v950_v52  ;;  %v949_v22 = vsel %vm261_vm1, %v912_v41, %v893_v51 }
 0x431   :  { %957 = vst.msk [vmem:[%s1653_s7] sm:$0xff] %vm278_vm2, %v949_v22 }
 0x433   :  { %v871_v4 = vpop.permute.xlu0 %870 }
 0x434   :  { %v896_v19 = vmul.f32 %v871_v4, %v1528_v14  ;;  %v866_v5 = vpop.permute.xlu1 %865 }
 0x435   :  { %v895_v26 = vmul.f32 %v866_v5, %v1530_v21 }
 0x436   :  { %v952_v49 = vsel %vm261_vm1, %v927_v43, %v896_v19 }
 0x437   :  { %960 = vst.msk [vmem:[%s1653_s7 + $0x18] sm:$0xff] %vm278_vm2, %v952_v49  ;;  %v951_v53 = vsel %vm261_vm1, %v922_v40, %v895_v26  ;;  %v881_v54 = vpop.permute.xlu0 %880 }
 0x438   :  { %959 = vst.msk [vmem:[%s1653_s7 + $0x10] sm:$0xff] %vm278_vm2, %v951_v53  ;;  %v898_v14 = vmul.f32 %v881_v54, %v1540_v33  ;;  %v876_v21 = vpop.permute.xlu1 %875 }
 0x439   :  { %v897_v55 = vmul.f32 %v876_v21, %v1542_v37 }
 0x43a   :  { %v954_v56 = vsel %vm261_vm1, %v937_v31, %v898_v14 }
 0x43b   :  { %962 = vst.msk [vmem:[%s1653_s7 + $0x28] sm:$0xff] %vm278_vm2, %v954_v56  ;;  %v953_v16 = vsel %vm261_vm1, %v932_v44, %v897_v55 }
 0x43c   :  { %961 = vst.msk [vmem:[%s1653_s7 + $0x20] sm:$0xff] %vm278_vm2, %v953_v16 }
 0x43d   :  { %v891_v33 = vpop.permute.xlu0 %890 }
 0x43e   :  { %v886_v57 = vpop.permute.xlu1 %885  ;;  %v900_v37 = vmul.f32 %v891_v33, %v1555_v32 }
 0x43f   :  { %v899_v58 = vmul.f32 %v886_v57, %v1558_v18 }
 0x441   :  { %v947_v24 = vpop.permute.xlu0 %946 }
 0x442   :  { %v956_v59 = vsel %vm261_vm1, %v947_v24, %v900_v37  ;;  %v942_v35 = vpop.permute.xlu1 %941 }
 0x443   :  { %964 = vst.msk [vmem:[%s1653_s7 + $0x38] sm:$0xff] %vm278_vm2, %v956_v59  ;;  %v955_v27 = vsel %vm261_vm1, %v942_v35, %v899_v58 }
 0x444   :  { %963 = vst.msk [vmem:[%s1653_s7 + $0x30] sm:$0xff] %vm278_vm2, %v955_v27 }
 0x445   :  { %973 = vsyncpa [#allocation3], 1 }

</bundles_post_ra>
